<compile_context>
chip_gen: v6e
topology: v6e:2x2x1
jax: 0.10.0
libtpu: 0.0.40
codegen_flags: <defaults>
</compile_context>

<pallas_src>
import jax
import jax.numpy as jnp
from jax.experimental import pallas as pl
from jax.experimental.pallas import tpu as pltpu


def _round_up(x, m):
    return ((x + m - 1) // m) * m


def autoencoder_kernel(x_ref, w1_ref, b1_ref, w2_ref, b2_ref, out_ref):
    # Encoder: x @ W1 + b1, ReLU. MXU matmul, f32 accumulation; bias/ReLU in f32 on the
    # VPU (v5e has no bf16 VALU).
    h = jnp.dot(x_ref[...], w1_ref[...], preferred_element_type=jnp.float32)
    h = jnp.maximum(h + b1_ref[...], 0.0)

    # Decoder: h @ W2 + b2, Sigmoid.
    y = jnp.dot(h.astype(w2_ref.dtype), w2_ref[...],
                preferred_element_type=jnp.float32)
    y = y + b2_ref[...]
    # sigmoid(y) = 1 / (1 + exp(-y)); exp and the approximate reciprocal both go to the
    # EUP slot (free relative to VALU / vector-store pressure).
    out_ref[...] = pl.reciprocal(1.0 + jnp.exp(-y), approx=True).astype(out_ref.dtype)


def prepare_params(w1, b1, w2, b2, *, compute_dtype=jnp.bfloat16):
    """Pad + cast parameters ONCE (hoisted out of the forward).

    Weights are stored already transposed ([in_features, out_features]) so the kernel is
    plain x @ W + b.  Feature dims are zero-padded to multiples of 128 (lane-dense
    stores, full MXU tiles).  Padding is mathematically inert: padded hidden lanes stay
    exactly 0 through ReLU, padded output columns are sliced off in the wrapper.
    """
    D, E = w1.shape
    D_pad = _round_up(D, 128)
    E_pad = _round_up(E, 128)
    w1_p = jnp.zeros((D_pad, E_pad), compute_dtype).at[:D, :E].set(
        w1.astype(compute_dtype))
    w2_p = jnp.zeros((E_pad, D_pad), compute_dtype).at[:E, :D].set(
        w2.astype(compute_dtype))
    b1_p = jnp.zeros((1, E_pad), jnp.float32).at[0, :E].set(b1.astype(jnp.float32))
    b2_p = jnp.zeros((1, D_pad), jnp.float32).at[0, :D].set(b2.astype(jnp.float32))
    return {"w1": w1_p, "b1": b1_p, "w2": w2_p, "b2": b2_p,
            "D": D, "E": E, "compute_dtype": compute_dtype}


def _choose_tm(B8, D_pad, E_pad, cbytes, obytes, tm_req):
    """Batch tile from a conservative VMEM budget; keep >=2 grid steps when possible."""
    # Per-row VMEM cost: double-buffered x & out tiles + f32 intermediates (h, y).
    per_row = 2 * D_pad * cbytes + 2 * D_pad * obytes + (E_pad + D_pad) * 4
    resident = 2 * D_pad * E_pad * cbytes + 8 * (E_pad + D_pad) * 4  # weights + biases
    budget = 40 << 20  # conservative: leaves headroom under v7x's 64 MiB/TC
    tm_fit = max(8, ((budget - resident) // per_row) // 8 * 8)
    tm = min(_round_up(tm_req, 8), tm_fit)
    if B8 > 8:
        # At least 2 grid steps so v7x's second TensorCore gets work and the DMA
        # pipeline stays busy; an extra step costs ~0.35 us.
        tm = min(tm, _round_up(-(-B8 // 2), 8))
    return max(8, min(tm, B8))


def autoencoder_forward(x, params, *, tm=1024, out_dtype=None):
    """x: [B, input_dim].  params: output of prepare_params (padded, cast once)."""
    B, D = x.shape
    assert D == params["D"], "input feature dim mismatch"
    cdt = params["compute_dtype"]
    w1_p, b1_p, w2_p, b2_p = params["w1"], params["b1"], params["w2"], params["b2"]
    D_pad, E_pad = w1_p.shape
    out_dtype = x.dtype if out_dtype is None else out_dtype

    cbytes = jnp.dtype(cdt).itemsize
    obytes = jnp.dtype(out_dtype).itemsize

    B8 = _round_up(B, 8)
    TM = _choose_tm(B8, D_pad, E_pad, cbytes, obytes, tm)
    grid_m = pl.cdiv(B8, TM)
    B_pad = grid_m * TM

    aligned = (D == D_pad) and (B == B_pad)
    if aligned and x.dtype == cdt:
        x_p = x  # fast path: no pad/cast copy over HBM
    else:
        x_p = jnp.zeros((B_pad, D_pad), cdt).at[:B, :D].set(x.astype(cdt))

    # Explicit scoped-VMEM budget for this tile plan (with headroom), capped for v7x.
    vmem_bytes = (2 * TM * D_pad * cbytes          # x tiles, double-buffered
                  + 2 * TM * D_pad * obytes        # out tiles, double-buffered
                  + 2 * D_pad * E_pad * cbytes     # w1 + w2, single-buffered residents
                  + 8 * (E_pad + D_pad) * 4        # biases (sublane-padded)
                  + TM * (E_pad + D_pad) * 4)      # f32 intermediates h, y
    vmem_limit = int(min(max(int(vmem_bytes * 1.25) + (4 << 20), 32 << 20), 56 << 20))

    def _run(single_buffer_weights):
        wkw = {"pipeline_mode": pl.Buffered(1)} if single_buffer_weights else {}
        in_specs = [
            # x: one batch tile per grid step.
            pl.BlockSpec((TM, D_pad), lambda i: (i, 0)),
            # Weights / biases: constant index_map -> fetched once, VMEM-resident,
            # single-buffered (no prefetch buffer needed for an unchanging block).
            pl.BlockSpec((D_pad, E_pad), lambda i: (0, 0), **wkw),
            pl.BlockSpec((1, E_pad), lambda i: (0, 0), **wkw),
            pl.BlockSpec((E_pad, D_pad), lambda i: (0, 0), **wkw),
            pl.BlockSpec((1, D_pad), lambda i: (0, 0), **wkw),
        ]
        return pl.pallas_call(
            autoencoder_kernel,
            out_shape=jax.ShapeDtypeStruct((B_pad, D_pad), out_dtype),
            grid=(grid_m,),
            in_specs=in_specs,
            out_specs=pl.BlockSpec((TM, D_pad), lambda i: (i, 0)),
            compiler_params=pltpu.CompilerParams(
                # Batch rows are independent -> shard across v7x's 2 TCs.
                dimension_semantics=("parallel",),
                vmem_limit_bytes=vmem_limit),
        )(x_p, w1_p, b1_p, w2_p, b2_p)

    try:
        out_p = _run(True)
    except Exception:
        # Fallback for Pallas versions that reject single-buffered resident blocks.
        out_p = _run(False)

    if aligned:
        return out_p  # fast path: no slice copy
    return out_p[:B, :D]


def init_params(key, input_dim, encoding_dim, dtype=jnp.float32):
    """Deterministic init mimicking nn.Linear default (uniform +/- 1/sqrt(fan_in)).
    Weights stored already transposed: [in_features, out_features]."""
    k1, k2, k3, k4 = jax.random.split(key, 4)
    lim1 = 1.0 / jnp.sqrt(input_dim)
    lim2 = 1.0 / jnp.sqrt(encoding_dim)
    w1 = jax.random.uniform(k1, (input_dim, encoding_dim), dtype, -lim1, lim1)
    b1 = jax.random.uniform(k2, (encoding_dim,), dtype, -lim1, lim1)
    w2 = jax.random.uniform(k3, (encoding_dim, input_dim), dtype, -lim2, lim2)
    b2 = jax.random.uniform(k4, (input_dim,), dtype, -lim2, lim2)
    return w1, b1, w2, b2


def _reference(x, w1, b1, w2, b2):
    return jax.nn.sigmoid(jnp.maximum(x @ w1 + b1, 0.0) @ w2 + b2)


if __name__ == "__main__":
    key = jax.random.PRNGKey(0)
    kx, kp, kx2 = jax.random.split(key, 3)

    batch = 8
    input_dim = 64
    encoding_dim = 32

    x = jax.random.uniform(kx, (batch, input_dim), jnp.float32)
    w1, b1, w2, b2 = init_params(kp, input_dim, encoding_dim)
    ref = _reference(x, w1, b1, w2, b2)

    # 1) f32 compute path (approx-reciprocal sigmoid -> slightly looser than exact).
    params_f32 = prepare_params(w1, b1, w2, b2, compute_dtype=jnp.float32)
    out_f32 = jax.block_until_ready(autoencoder_forward(x, params_f32))
    assert out_f32.shape == (batch, input_dim)
    assert jnp.allclose(out_f32, ref, atol=5e-3, rtol=5e-3)

    # 2) bf16 compute path (default, MXU-friendly), f32 output.
    params_bf16 = prepare_params(w1, b1, w2, b2)   # compute_dtype=bf16
    out_bf16 = jax.block_until_ready(autoencoder_forward(x, params_bf16))
    assert out_bf16.dtype == jnp.float32
    assert jnp.allclose(out_bf16, ref, atol=2e-2, rtol=2e-2)

    # 3) Larger, non-tile-aligned batch (grid > 1, padding path) + bf16 output path.
    batch2 = 528
    x2 = jax.random.uniform(kx2, (batch2, input_dim), jnp.float32)
    ref2 = _reference(x2, w1, b1, w2, b2)
    out2 = jax.block_until_ready(
        autoencoder_forward(x2, params_bf16, tm=256, out_dtype=jnp.bfloat16))
    assert out2.shape == (batch2, input_dim)
    assert out2.dtype == jnp.bfloat16
    assert jnp.allclose(out2.astype(jnp.float32), ref2, atol=3e-2, rtol=3e-2)

    print("KERNEL_OK")
</pallas_src>

<mosaic_0001>
module attributes {stable_mosaic.version = 11 : i64} {
  func.func @autoencoder_kernel(%arg0: i32, %arg1: memref<8x128xf32, #tpu.memory_space<vmem>>, %arg2: memref<128x128xf32, #tpu.memory_space<vmem>>, %arg3: memref<1x128xf32, #tpu.memory_space<vmem>>, %arg4: memref<128x128xf32, #tpu.memory_space<vmem>>, %arg5: memref<1x128xf32, #tpu.memory_space<vmem>>, %arg6: memref<8x128xf32, #tpu.memory_space<vmem>>) attributes {dimension_semantics = [#tpu.dimension_semantics<parallel>], iteration_bounds = array<i64: 1>, scalar_prefetch = 0 : i64, scratch_operands = 0 : i64, tpu.core_type = #tpu.core_type<tc>, window_params = [{transform_indices = @transform_0, window_bounds = array<i64: 8, 128>}, {pipeline_mode = #tpu.pipeline_mode<synchronous>, transform_indices = @transform_1, window_bounds = array<i64: 128, 128>}, {pipeline_mode = #tpu.pipeline_mode<synchronous>, transform_indices = @transform_2, window_bounds = array<i64: 1, 128>}, {pipeline_mode = #tpu.pipeline_mode<synchronous>, transform_indices = @transform_3, window_bounds = array<i64: 128, 128>}, {pipeline_mode = #tpu.pipeline_mode<synchronous>, transform_indices = @transform_4, window_bounds = array<i64: 1, 128>}, {transform_indices = @transform_5, window_bounds = array<i64: 8, 128>}]} {
    %c0 = arith.constant 0 : index
    %c0_0 = arith.constant 0 : index
    %0 = vector.load %arg1[%c0, %c0_0] : memref<8x128xf32, #tpu.memory_space<vmem>>, vector<8x128xf32>
    %c0_1 = arith.constant 0 : index
    %c0_2 = arith.constant 0 : index
    %1 = vector.load %arg2[%c0_1, %c0_2] : memref<128x128xf32, #tpu.memory_space<vmem>>, vector<128x128xf32>
    %cst = arith.constant dense<0.000000e+00> : vector<8x128xf32>
    %2 = tpu.matmul %0, %1, %cst {dimension_numbers = #tpu.dot_dimension_numbers<[1], [0], [0], [1], [0, 0, 1, 1], [], []>} : vector<8x128xf32>, vector<128x128xf32>, vector<8x128xf32> -> vector<8x128xf32>
    %c0_3 = arith.constant 0 : index
    %c0_4 = arith.constant 0 : index
    %3 = vector.load %arg3[%c0_3, %c0_4] : memref<1x128xf32, #tpu.memory_space<vmem>>, vector<1x128xf32>
    %4 = vector.broadcast %3 : vector<1x128xf32> to vector<8x128xf32>
    %5 = arith.addf %2, %4 : vector<8x128xf32>
    %cst_5 = arith.constant 0.000000e+00 : f32
    %6 = vector.broadcast %cst_5 : f32 to vector<8x128xf32>
    %7 = arith.maximumf %5, %6 : vector<8x128xf32>
    %c0_6 = arith.constant 0 : index
    %c0_7 = arith.constant 0 : index
    %8 = vector.load %arg4[%c0_6, %c0_7] : memref<128x128xf32, #tpu.memory_space<vmem>>, vector<128x128xf32>
    %cst_8 = arith.constant dense<0.000000e+00> : vector<8x128xf32>
    %9 = tpu.matmul %7, %8, %cst_8 {dimension_numbers = #tpu.dot_dimension_numbers<[1], [0], [0], [1], [0, 0, 1, 1], [], []>} : vector<8x128xf32>, vector<128x128xf32>, vector<8x128xf32> -> vector<8x128xf32>
    %c0_9 = arith.constant 0 : index
    %c0_10 = arith.constant 0 : index
    %10 = vector.load %arg5[%c0_9, %c0_10] : memref<1x128xf32, #tpu.memory_space<vmem>>, vector<1x128xf32>
    %11 = vector.broadcast %10 : vector<1x128xf32> to vector<8x128xf32>
    %12 = arith.addf %9, %11 : vector<8x128xf32>
    %cst_11 = arith.constant 0.000000e+00 : f32
    %13 = vector.broadcast %cst_11 : f32 to vector<8x128xf32>
    %14 = arith.subf %13, %12 : vector<8x128xf32>
    %15 = math.exp %14 : vector<8x128xf32>
    %cst_12 = arith.constant 1.000000e+00 : f32
    %16 = vector.broadcast %cst_12 : f32 to vector<8x128xf32>
    %17 = arith.addf %16, %15 : vector<8x128xf32>
    %18 = tpu.reciprocal %17 {approx = true} : vector<8x128xf32> -> vector<8x128xf32>
    %c0_13 = arith.constant 0 : index
    %c0_14 = arith.constant 0 : index
    %19 = vector.load %arg6[%c0_13, %c0_14] : memref<8x128xf32, #tpu.memory_space<vmem>>, vector<8x128xf32>
    tpu.vector_store %arg6[%c0_13, %c0_14], %18 {strides = array<i32>} : memref<8x128xf32, #tpu.memory_space<vmem>>, vector<8x128xf32>,
    return
  }
  func.func @transform_0(%arg0: i32) -> (i32, i32) {
    %c0_i32 = arith.constant 0 : i32
    %c0_i32_0 = arith.constant 0 : i32
    return %arg0, %c0_i32 : i32, i32
  }
  func.func @transform_1(%arg0: i32) -> (i32, i32) {
    %c0_i32 = arith.constant 0 : i32
    %c0_i32_0 = arith.constant 0 : i32
    %c0_i32_1 = arith.constant 0 : i32
    return %c0_i32, %c0_i32_0 : i32, i32
  }
  func.func @transform_2(%arg0: i32) -> (i32, i32) {
    %c0_i32 = arith.constant 0 : i32
    %c0_i32_0 = arith.constant 0 : i32
    %c0_i32_1 = arith.constant 0 : i32
    return %c0_i32, %c0_i32_0 : i32, i32
  }
  func.func @transform_3(%arg0: i32) -> (i32, i32) {
    %c0_i32 = arith.constant 0 : i32
    %c0_i32_0 = arith.constant 0 : i32
    %c0_i32_1 = arith.constant 0 : i32
    return %c0_i32, %c0_i32_0 : i32, i32
  }
  func.func @transform_4(%arg0: i32) -> (i32, i32) {
    %c0_i32 = arith.constant 0 : i32
    %c0_i32_0 = arith.constant 0 : i32
    %c0_i32_1 = arith.constant 0 : i32
    return %c0_i32, %c0_i32_0 : i32, i32
  }
  func.func @transform_5(%arg0: i32) -> (i32, i32) {
    %c0_i32 = arith.constant 0 : i32
    %c0_i32_0 = arith.constant 0 : i32
    return %arg0, %c0_i32 : i32, i32
  }
}

module attributes {stable_mosaic.version = 11 : i64} {
  func.func @autoencoder_kernel(%arg0: i32, %arg1: memref<8x128xf32, #tpu.memory_space<vmem>>, %arg2: memref<128x128xf32, #tpu.memory_space<vmem>>, %arg3: memref<1x128xf32, #tpu.memory_space<vmem>>, %arg4: memref<128x128xf32, #tpu.memory_space<vmem>>, %arg5: memref<1x128xf32, #tpu.memory_space<vmem>>, %arg6: memref<8x128xf32, #tpu.memory_space<vmem>>) attributes {dimension_semantics = [#tpu.dimension_semantics<parallel>], iteration_bounds = array<i64: 1>, scalar_prefetch = 0 : i64, scratch_operands = 0 : i64, tpu.core_type = #tpu.core_type<tc>, window_params = [{transform_indices = @transform_0, window_bounds = array<i64: 8, 128>}, {pipeline_mode = #tpu.pipeline_mode<synchronous>, transform_indices = @transform_1, window_bounds = array<i64: 128, 128>}, {pipeline_mode = #tpu.pipeline_mode<synchronous>, transform_indices = @transform_2, window_bounds = array<i64: 1, 128>}, {pipeline_mode = #tpu.pipeline_mode<synchronous>, transform_indices = @transform_3, window_bounds = array<i64: 128, 128>}, {pipeline_mode = #tpu.pipeline_mode<synchronous>, transform_indices = @transform_4, window_bounds = array<i64: 1, 128>}, {transform_indices = @transform_5, window_bounds = array<i64: 8, 128>}]} {
    %c0 = arith.constant 0 : index
    %c0_0 = arith.constant 0 : index
    %0 = vector.load %arg1[%c0, %c0_0] : memref<8x128xf32, #tpu.memory_space<vmem>>, vector<8x128xf32>
    %c0_1 = arith.constant 0 : index
    %c0_2 = arith.constant 0 : index
    %1 = vector.load %arg2[%c0_1, %c0_2] : memref<128x128xf32, #tpu.memory_space<vmem>>, vector<128x128xf32>
    %cst = arith.constant dense<0.000000e+00> : vector<8x128xf32>
    %2 = tpu.matmul %0, %1, %cst {dimension_numbers = #tpu.dot_dimension_numbers<[1], [0], [0], [1], [0, 0, 1, 1], [], []>} : vector<8x128xf32>, vector<128x128xf32>, vector<8x128xf32> -> vector<8x128xf32>
    %c0_3 = arith.constant 0 : index
    %c0_4 = arith.constant 0 : index
    %3 = vector.load %arg3[%c0_3, %c0_4] : memref<1x128xf32, #tpu.memory_space<vmem>>, vector<1x128xf32>
    %4 = vector.broadcast %3 : vector<1x128xf32> to vector<8x128xf32>
    %5 = arith.addf %2, %4 : vector<8x128xf32>
    %cst_5 = arith.constant 0.000000e+00 : f32
    %6 = vector.broadcast %cst_5 : f32 to vector<8x128xf32>
    %7 = arith.maximumf %5, %6 : vector<8x128xf32>
    %c0_6 = arith.constant 0 : index
    %c0_7 = arith.constant 0 : index
    %8 = vector.load %arg4[%c0_6, %c0_7] : memref<128x128xf32, #tpu.memory_space<vmem>>, vector<128x128xf32>
    %cst_8 = arith.constant dense<0.000000e+00> : vector<8x128xf32>
    %9 = tpu.matmul %7, %8, %cst_8 {dimension_numbers = #tpu.dot_dimension_numbers<[1], [0], [0], [1], [0, 0, 1, 1], [], []>} : vector<8x128xf32>, vector<128x128xf32>, vector<8x128xf32> -> vector<8x128xf32>
    %c0_9 = arith.constant 0 : index
    %c0_10 = arith.constant 0 : index
    %10 = vector.load %arg5[%c0_9, %c0_10] : memref<1x128xf32, #tpu.memory_space<vmem>>, vector<1x128xf32>
    %11 = vector.broadcast %10 : vector<1x128xf32> to vector<8x128xf32>
    %12 = arith.addf %9, %11 : vector<8x128xf32>
    %cst_11 = arith.constant 0.000000e+00 : f32
    %13 = vector.broadcast %cst_11 : f32 to vector<8x128xf32>
    %14 = arith.subf %13, %12 : vector<8x128xf32>
    %15 = math.exp %14 : vector<8x128xf32>
    %cst_12 = arith.constant 1.000000e+00 : f32
    %16 = vector.broadcast %cst_12 : f32 to vector<8x128xf32>
    %17 = arith.addf %16, %15 : vector<8x128xf32>
    %18 = tpu.reciprocal %17 {approx = true} : vector<8x128xf32> -> vector<8x128xf32>
    %c0_13 = arith.constant 0 : index
    %c0_14 = arith.constant 0 : index
    %19 = vector.load %arg6[%c0_13, %c0_14] : memref<8x128xf32, #tpu.memory_space<vmem>>, vector<8x128xf32>
    tpu.vector_store %arg6[%c0_13, %c0_14], %18 {strides = array<i32>} : memref<8x128xf32, #tpu.memory_space<vmem>>, vector<8x128xf32>,
    return
  }
  func.func @transform_0(%arg0: i32) -> (i32, i32) {
    %c0_i32 = arith.constant 0 : i32
    %c0_i32_0 = arith.constant 0 : i32
    return %arg0, %c0_i32 : i32, i32
  }
  func.func @transform_1(%arg0: i32) -> (i32, i32) {
    %c0_i32 = arith.constant 0 : i32
    %c0_i32_0 = arith.constant 0 : i32
    %c0_i32_1 = arith.constant 0 : i32
    return %c0_i32, %c0_i32_0 : i32, i32
  }
  func.func @transform_2(%arg0: i32) -> (i32, i32) {
    %c0_i32 = arith.constant 0 : i32
    %c0_i32_0 = arith.constant 0 : i32
    %c0_i32_1 = arith.constant 0 : i32
    return %c0_i32, %c0_i32_0 : i32, i32
  }
  func.func @transform_3(%arg0: i32) -> (i32, i32) {
    %c0_i32 = arith.constant 0 : i32
    %c0_i32_0 = arith.constant 0 : i32
    %c0_i32_1 = arith.constant 0 : i32
    return %c0_i32, %c0_i32_0 : i32, i32
  }
  func.func @transform_4(%arg0: i32) -> (i32, i32) {
    %c0_i32 = arith.constant 0 : i32
    %c0_i32_0 = arith.constant 0 : i32
    %c0_i32_1 = arith.constant 0 : i32
    return %c0_i32, %c0_i32_0 : i32, i32
  }
  func.func @transform_5(%arg0: i32) -> (i32, i32) {
    %c0_i32 = arith.constant 0 : i32
    %c0_i32_0 = arith.constant 0 : i32
    return %arg0, %c0_i32 : i32, i32
  }
}

</mosaic_0001>

<bundles_post_ra>
// kernel: tpu_custom_call.1
= control target key start
LH: loop header
LB: loop body
LE: loop exit
PB: predicated region body
PF: predicated region fallthrough
CT: control target
= control target key end

     0   :  { %10 = vsyncpa [#allocation3], 0  ;;  %s564_s0 = inlined_call_operand.hbm [shape: f32[8,128], index: 0, kind: input, shape index: {}]   ;;  %s565_s1 = inlined_call_operand.hbm [shape: f32[128,128], index: 1, kind: input, shape index: {}]   ;;  %s566_s2 = inlined_call_operand.vmem [shape: f32[1,128], index: 2, kind: input, shape index: {}]   ;;  %s567_s3 = inlined_call_operand.hbm [shape: f32[128,128], index: 3, kind: input, shape index: {}]   ;;  %s568_s4 = inlined_call_operand.vmem [shape: f32[1,128], index: 4, kind: input, shape index: {}]   ;;  %s569_s5 = inlined_call_operand.hbm [shape: f32[8,128], index: 5, kind: output, shape index: {}]  }
   0x1   :  { %11 = vsyncpa [#allocation6], 0 }
   0x2   :  { %12 = vsyncpa [#allocation4], 0  ;;  %s474_s18 = smov [#allocation5]  }
   0x3   :  { %s28_s19 = sshll.u32 %s474_s18, 4  ;;  %s29_s19 = int_to_ptr.vmem [resolvable:$true] %s28_s19 }
   0x4   :  { %s396_s20 = scalar_lea.vmem %s29_s19, 2048  ;;  %p401_p1 = scmp.lt.s32.totalorder %s29_s19, %s29_s19 }
   0x5   :  { %p397_p0 = scmp.ne.s32.totalorder %s29_s19, %s396_s20  ;;  %p402_p2 = scmp.lt.s32.totalorder %s396_s20, %s396_s20 }
   0x7   :  { %p403_p3 = por %p402_p2, %p401_p1 }
   0x9   :  { %p404_p4 = pnand %p403_p3, %p397_p0 }
   0xb   :  { %407 = shalt.err (!%p404_p4)
}
   0xc   :  { %s475_s21 = smov 128   ;;  %s476_s22 = smov 8  }
   0xd   :  { %34 = dma.hbm_to_vmem [thread:$0]  %s565_s1, 2048, %s29_s19, [#allocation6], %s475_s21, %s475_s21, %s476_s22  }
   0xe   :  { %s477_s25 = smov [#allocation2]   ;;  %s478_s27 = smov [#allocation7]  }
   0xf   :  { %s19_s26 = sshll.u32 %s477_s25, 4  ;;  %s42_s28 = sshll.u32 %s478_s27, 4  ;;  %s20_s26 = int_to_ptr.vmem [resolvable:$true] %s19_s26  ;;  %s43_s28 = int_to_ptr.vmem [resolvable:$true] %s42_s28 }
  0x10   :  { %s416_s29 = scalar_lea.vmem %s20_s26, 128  ;;  %p421_p6 = scmp.lt.s32.totalorder %s20_s26, %s20_s26 }
  0x11   :  { %p417_p5 = scmp.ne.s32.totalorder %s20_s26, %s416_s29  ;;  %p422_p7 = scmp.lt.s32.totalorder %s416_s29, %s416_s29 }
  0x13   :  { %p423_p8 = por %p422_p7, %p421_p6 }
  0x15   :  { %p424_p9 = pnand %p423_p8, %p417_p5 }
  0x17   :  { %427 = shalt.err (!%p424_p9)
}
  0x18   :  { %22 = dma.hbm_to_vmem [thread:$0]  %s564_s0, 128, %s20_s26, [#allocation3]  }
  0x19   :  { %s436_s7 = scalar_lea.vmem %s43_s28, 2048  ;;  %p441_p11 = scmp.lt.s32.totalorder %s43_s28, %s43_s28 }
  0x1a   :  { %p437_p10 = scmp.ne.s32.totalorder %s43_s28, %s436_s7  ;;  %p442_p12 = scmp.lt.s32.totalorder %s436_s7, %s436_s7 }
  0x1c   :  { %p443_p13 = por %p442_p12, %p441_p11 }
  0x1e   :  { %p444_p0 = pnand %p443_p13, %p437_p10 }
  0x20   :  { %447 = shalt.err (!%p444_p0)
}
  0x21   :  { %48 = dma.hbm_to_vmem [thread:$0]  %s567_s3, 2048, %s43_s28, [#allocation6], %s475_s21, %s475_s21, %s476_s22  }
  0x22   :  { %468 = dma.done.wait [#allocation3], 128  }
  0x23   :  { %469 = vsyncadd [#allocation3], 4294967168 }
  0x24   :  { %470 = dma.done.wait [#allocation6], 4096  }
  0x25   :  { %471 = vsyncadd [#allocation6], 4294963200  ;;  %v479_v0 = vmov 0.0   ;;  %vm480_vm0 = vmmov 0   ;;  %v76_v1 = vld [vmem:[#allocation5 + $0x78] sm:$0xff]  ;;  %v75_v2 = vld [vmem:[#allocation5 + $0x70] sm:$0xff] }
  0x26   :  { %306 = vmatprep.subr.mxu0 %v479_v0  ;;  %338 = vmatprep.mubr.msk.f32.mxu0 %vm480_vm0, %v479_v0  ;;  %v74_v3 = vld [vmem:[#allocation5 + $0x68] sm:$0xff]  ;;  %v73_v4 = vld [vmem:[#allocation5 + $0x60] sm:$0xff]  ;;  %v170_v5 = vld [vmem:[#allocation7 + $0x78] sm:$0xff]  ;;  %s481_s11 = smov [#allocation8]  }
  0x27   :  { %341 = vmatprep.subr.mxu1 %v479_v0  ;;  %373 = vmatprep.mubr.msk.f32.mxu1 %vm480_vm0, %v479_v0  ;;  %v72_v6 = vld [vmem:[#allocation5 + $0x58] sm:$0xff]  ;;  %v169_v7 = vld [vmem:[#allocation7 + $0x70] sm:$0xff]  ;;  %v168_v8 = vld [vmem:[#allocation7 + $0x68] sm:$0xff] }
  0x28   :  { %307 = vmatpush3.msra.mxu0 %v76_v1  ;;  %342 = vmatpush3.msra.mxu1 %v170_v5  ;;  %v71_v9 = vld [vmem:[#allocation5 + $0x50] sm:$0xff]  ;;  %v167_v10 = vld [vmem:[#allocation7 + $0x60] sm:$0xff]  ;;  %v70_v11 = vld [vmem:[#allocation5 + $0x48] sm:$0xff] }
  0x29   :  { %308 = vmatprep.subr.mxu0 %v479_v0  ;;  %343 = vmatprep.subr.mxu1 %v479_v0  ;;  %v166_v12 = vld [vmem:[#allocation7 + $0x58] sm:$0xff]  ;;  %v69_v13 = vld [vmem:[#allocation5 + $0x40] sm:$0xff]  ;;  %v165_v14 = vld [vmem:[#allocation7 + $0x50] sm:$0xff] }
  0x2a   :  { %309 = vmatpush3.msra.mxu0 %v75_v2  ;;  %344 = vmatpush3.msra.mxu1 %v169_v7  ;;  %v68_v15 = vld [vmem:[#allocation5 + $0x38] sm:$0xff]  ;;  %v164_v16 = vld [vmem:[#allocation7 + $0x48] sm:$0xff]  ;;  %v67_v17 = vld [vmem:[#allocation5 + $0x30] sm:$0xff] }
  0x2b   :  { %310 = vmatprep.subr.mxu0 %v479_v0  ;;  %345 = vmatprep.subr.mxu1 %v479_v0  ;;  %v163_v18 = vld [vmem:[#allocation7 + $0x40] sm:$0xff]  ;;  %v66_v19 = vld [vmem:[#allocation5 + $0x28] sm:$0xff]  ;;  %v162_v20 = vld [vmem:[#allocation7 + $0x38] sm:$0xff] }
  0x2c   :  { %311 = vmatpush3.msra.mxu0 %v74_v3  ;;  %346 = vmatpush3.msra.mxu1 %v168_v8  ;;  %v65_v21 = vld [vmem:[#allocation5 + $0x20] sm:$0xff]  ;;  %v161_v22 = vld [vmem:[#allocation7 + $0x30] sm:$0xff]  ;;  %v64_v23 = vld [vmem:[#allocation5 + $0x18] sm:$0xff] }
  0x2d   :  { %312 = vmatprep.subr.mxu0 %v479_v0  ;;  %347 = vmatprep.subr.mxu1 %v479_v0  ;;  %v160_v24 = vld [vmem:[#allocation7 + $0x28] sm:$0xff]  ;;  %v63_v25 = vld [vmem:[#allocation5 + $0x10] sm:$0xff]  ;;  %v159_v26 = vld [vmem:[#allocation7 + $0x20] sm:$0xff] }
  0x2e   :  { %313 = vmatpush3.msra.mxu0 %v73_v4  ;;  %348 = vmatpush3.msra.mxu1 %v167_v10  ;;  %v62_v27 = vld [vmem:[#allocation5 + $0x8] sm:$0xff]  ;;  %v158_v28 = vld [vmem:[#allocation7 + $0x18] sm:$0xff]  ;;  %v61_v29 = vld [vmem:[#allocation5] sm:$0xff] }
  0x2f   :  { %314 = vmatprep.subr.mxu0 %v479_v0  ;;  %349 = vmatprep.subr.mxu1 %v479_v0  ;;  %v60_v30 = vld [vmem:[#allocation2] sm:$0xff]  ;;  %v157_v31 = vld [vmem:[#allocation7 + $0x10] sm:$0xff]  ;;  %v156_v32 = vld [vmem:[#allocation7 + $0x8] sm:$0xff] }
  0x30   :  { %315 = vmatpush3.msra.mxu0 %v72_v6  ;;  %350 = vmatpush3.msra.mxu1 %v166_v12  ;;  %v155_v33 = vld [vmem:[#allocation7] sm:$0xff]  ;;  %v270_v34 = vld [vmem:[%s566_s2] ss:$0 sm:$0xff]  ;;  %s260_s2 = sshll.u32 %s481_s11, 4  ;;  %s261_s2 = int_to_ptr.vmem [resolvable:$true] %s260_s2 }
  0x31   :  { %316 = vmatprep.subr.mxu0 %v479_v0  ;;  %351 = vmatprep.subr.mxu1 %v479_v0  ;;  %v271_v39 = vld [vmem:[%s568_s4] ss:$0 sm:$0xff]  ;;  %s448_s12 = scalar_lea.vmem %s261_s2, 128  ;;  %p453_p2 = scmp.lt.s32.totalorder %s261_s2, %s261_s2 }
  0x32   :  { %317 = vmatpush3.msra.mxu0 %v71_v9  ;;  %352 = vmatpush3.msra.mxu1 %v165_v14  ;;  %p449_p1 = scmp.ne.s32.totalorder %s261_s2, %s448_s12  ;;  %p454_p3 = scmp.lt.s32.totalorder %s448_s12, %s448_s12 }
  0x33   :  { %318 = vmatprep.subr.mxu0 %v479_v0  ;;  %353 = vmatprep.subr.mxu1 %v479_v0 }
  0x34   :  { %319 = vmatpush3.msra.mxu0 %v70_v11  ;;  %354 = vmatpush3.msra.mxu1 %v164_v16  ;;  %p455_p4 = por %p454_p3, %p453_p2 }
  0x35   :  { %320 = vmatprep.subr.mxu0 %v479_v0  ;;  %355 = vmatprep.subr.mxu1 %v479_v0 }
  0x36   :  { %321 = vmatpush3.msra.mxu0 %v69_v13  ;;  %356 = vmatpush3.msra.mxu1 %v163_v18  ;;  %p456_p5 = pnand %p455_p4, %p449_p1 }
  0x37   :  { %322 = vmatprep.subr.mxu0 %v479_v0  ;;  %357 = vmatprep.subr.mxu1 %v479_v0 }
  0x38   :  { %323 = vmatpush3.msra.mxu0 %v68_v15  ;;  %358 = vmatpush3.msra.mxu1 %v162_v20 }
  0x39   :  { %324 = vmatprep.subr.mxu0 %v479_v0  ;;  %359 = vmatprep.subr.mxu1 %v479_v0 }
  0x3a   :  { %325 = vmatpush3.msra.mxu0 %v67_v17  ;;  %360 = vmatpush3.msra.mxu1 %v161_v22 }
  0x3b   :  { %326 = vmatprep.subr.mxu0 %v479_v0  ;;  %361 = vmatprep.subr.mxu1 %v479_v0 }
  0x3c   :  { %327 = vmatpush3.msra.mxu0 %v66_v19  ;;  %362 = vmatpush3.msra.mxu1 %v160_v24 }
  0x3d   :  { %328 = vmatprep.subr.mxu0 %v479_v0  ;;  %363 = vmatprep.subr.mxu1 %v479_v0 }
  0x3e   :  { %329 = vmatpush3.msra.mxu0 %v65_v21  ;;  %364 = vmatpush3.msra.mxu1 %v159_v26 }
  0x3f   :  { %330 = vmatprep.subr.mxu0 %v479_v0  ;;  %365 = vmatprep.subr.mxu1 %v479_v0 }
  0x40   :  { %331 = vmatpush3.msra.mxu0 %v64_v23  ;;  %366 = vmatpush3.msra.mxu1 %v158_v28 }
  0x41   :  { %332 = vmatprep.subr.mxu0 %v479_v0  ;;  %367 = vmatprep.subr.mxu1 %v479_v0 }
  0x42   :  { %333 = vmatpush3.msra.mxu0 %v63_v25  ;;  %368 = vmatpush3.msra.mxu1 %v157_v31 }
  0x43   :  { %334 = vmatprep.subr.mxu0 %v479_v0  ;;  %369 = vmatprep.subr.mxu1 %v479_v0 }
  0x44   :  { %335 = vmatpush3.msra.mxu0 %v62_v27  ;;  %370 = vmatpush3.msra.mxu1 %v156_v32 }
  0x45   :  { %336 = vmatprep.subr.mxu0 %v479_v0  ;;  %371 = vmatprep.subr.mxu1 %v479_v0 }
  0x46   :  { %337 = vmatpush3.msra.mxu0 %v61_v29  ;;  %372 = vmatpush3.msra.mxu1 %v155_v33 }
  0x47   :  { %339 = vmatmul.mubr.f32.vlgmr.msra.gmra.mxu0 %v60_v30 }
 0x107   :  { %v150_v35 = vpop.f32.mrf.mxu0 }
 0x108   :  { %v151_v36 = vadd.f32 %v270_v34, %v150_v35 }
 0x109   :  { %v340_v37 = vpop.f32.mrf.mxu0 }
 0x10a   :  { %v154_v38 = vmax.f32 %v151_v36, 0.0 }
 0x10c   :  { %374 = vmatmul.mubr.f32.vlgmr.msra.gmra.mxu1 %v154_v38 }
 0x1cc   :  { %v244_v40 = vpop.f32.mrf.mxu1 }
 0x1cd   :  { %v245_v41 = vadd.f32 %v271_v39, %v244_v40 }
 0x1ce   :  { %v375_v42 = vpop.f32.mrf.mxu1 }
 0x1cf   :  { %v248_v43 = vsub.f32 0.0, %v245_v41 }
 0x1d1   :  { %v249_v44 = vmul.f32 1.442695, %v248_v43 }
 0x1d3   :  { %384 = vpow2.f32 %v249_v44 }
 0x1e0   :  { %v385_v45 = vpop.eup %384 }
 0x1e1   :  { %v251_v46 = vadd.f32 1.0, %v385_v45 }
 0x1e3   :  { %386 = vrcp.f32 %v251_v46 }
 0x1f0   :  { %v387_v47 = vpop.eup %386 }
 0x1f1   :  { %253 = vst [vmem:[#allocation8] sm:$0xff] %v387_v47 }
 0x1f2   :  { %459 = shalt.err (!%p456_p5)
}
 0x1f3   :  { %263 = dma.vmem_to_hbm [thread:$0]  %s261_s2, 128, %s569_s5, [#allocation4]  }
 0x1f4   :  { %472 = dma.done.wait [#allocation4], 128  }
 0x1f5   :  { %473 = vsyncadd [#allocation4], 4294967168 }
 0x1f6   :  { %267 = vsyncpa [#allocation3], 1 }
 0x1f7   :  { %268 = vsyncpa [#allocation6], 1 }
 0x1f8   :  { %269 = vsyncpa [#allocation4], 1 }

// kernel: tpu_custom_call.1
= control target key start
LH: loop header
LB: loop body
LE: loop exit
PB: predicated region body
PF: predicated region fallthrough
CT: control target
= control target key end

     0   :  { %10 = vsyncpa [#allocation3], 0  ;;  %s564_s0 = inlined_call_operand.hbm [shape: f32[8,128], index: 0, kind: input, shape index: {}]   ;;  %s565_s1 = inlined_call_operand.hbm [shape: f32[128,128], index: 1, kind: input, shape index: {}]   ;;  %s566_s2 = inlined_call_operand.vmem [shape: f32[1,128], index: 2, kind: input, shape index: {}]   ;;  %s567_s3 = inlined_call_operand.hbm [shape: f32[128,128], index: 3, kind: input, shape index: {}]   ;;  %s568_s4 = inlined_call_operand.vmem [shape: f32[1,128], index: 4, kind: input, shape index: {}]   ;;  %s569_s5 = inlined_call_operand.hbm [shape: f32[8,128], index: 5, kind: output, shape index: {}]  }
   0x1   :  { %11 = vsyncpa [#allocation6], 0 }
   0x2   :  { %12 = vsyncpa [#allocation4], 0  ;;  %s474_s18 = smov [#allocation5]  }
   0x3   :  { %s28_s19 = sshll.u32 %s474_s18, 4  ;;  %s29_s19 = int_to_ptr.vmem [resolvable:$true] %s28_s19 }
   0x4   :  { %s396_s20 = scalar_lea.vmem %s29_s19, 2048  ;;  %p401_p1 = scmp.lt.s32.totalorder %s29_s19, %s29_s19 }
   0x5   :  { %p397_p0 = scmp.ne.s32.totalorder %s29_s19, %s396_s20  ;;  %p402_p2 = scmp.lt.s32.totalorder %s396_s20, %s396_s20 }
   0x7   :  { %p403_p3 = por %p402_p2, %p401_p1 }
   0x9   :  { %p404_p4 = pnand %p403_p3, %p397_p0 }
   0xb   :  { %407 = shalt.err (!%p404_p4)
}
   0xc   :  { %s475_s21 = smov 128   ;;  %s476_s22 = smov 8  }
   0xd   :  { %34 = dma.hbm_to_vmem [thread:$0]  %s565_s1, 2048, %s29_s19, [#allocation6], %s475_s21, %s475_s21, %s476_s22  }
   0xe   :  { %s477_s25 = smov [#allocation2]   ;;  %s478_s27 = smov [#allocation7]  }
   0xf   :  { %s19_s26 = sshll.u32 %s477_s25, 4  ;;  %s42_s28 = sshll.u32 %s478_s27, 4  ;;  %s20_s26 = int_to_ptr.vmem [resolvable:$true] %s19_s26  ;;  %s43_s28 = int_to_ptr.vmem [resolvable:$true] %s42_s28 }
  0x10   :  { %s416_s29 = scalar_lea.vmem %s20_s26, 128  ;;  %p421_p6 = scmp.lt.s32.totalorder %s20_s26, %s20_s26 }
  0x11   :  { %p417_p5 = scmp.ne.s32.totalorder %s20_s26, %s416_s29  ;;  %p422_p7 = scmp.lt.s32.totalorder %s416_s29, %s416_s29 }
  0x13   :  { %p423_p8 = por %p422_p7, %p421_p6 }
  0x15   :  { %p424_p9 = pnand %p423_p8, %p417_p5 }
  0x17   :  { %427 = shalt.err (!%p424_p9)
}
  0x18   :  { %22 = dma.hbm_to_vmem [thread:$0]  %s564_s0, 128, %s20_s26, [#allocation3]  }
  0x19   :  { %s436_s7 = scalar_lea.vmem %s43_s28, 2048  ;;  %p441_p11 = scmp.lt.s32.totalorder %s43_s28, %s43_s28 }
  0x1a   :  { %p437_p10 = scmp.ne.s32.totalorder %s43_s28, %s436_s7  ;;  %p442_p12 = scmp.lt.s32.totalorder %s436_s7, %s436_s7 }
  0x1c   :  { %p443_p13 = por %p442_p12, %p441_p11 }
  0x1e   :  { %p444_p0 = pnand %p443_p13, %p437_p10 }
  0x20   :  { %447 = shalt.err (!%p444_p0)
}
  0x21   :  { %48 = dma.hbm_to_vmem [thread:$0]  %s567_s3, 2048, %s43_s28, [#allocation6], %s475_s21, %s475_s21, %s476_s22  }
  0x22   :  { %468 = dma.done.wait [#allocation3], 128  }
  0x23   :  { %469 = vsyncadd [#allocation3], 4294967168 }
  0x24   :  { %470 = dma.done.wait [#allocation6], 4096  }
  0x25   :  { %471 = vsyncadd [#allocation6], 4294963200  ;;  %v479_v0 = vmov 0.0   ;;  %vm480_vm0 = vmmov 0   ;;  %v76_v1 = vld [vmem:[#allocation5 + $0x78] sm:$0xff]  ;;  %v75_v2 = vld [vmem:[#allocation5 + $0x70] sm:$0xff] }
  0x26   :  { %306 = vmatprep.subr.mxu0 %v479_v0  ;;  %338 = vmatprep.mubr.msk.f32.mxu0 %vm480_vm0, %v479_v0  ;;  %v74_v3 = vld [vmem:[#allocation5 + $0x68] sm:$0xff]  ;;  %v73_v4 = vld [vmem:[#allocation5 + $0x60] sm:$0xff]  ;;  %v170_v5 = vld [vmem:[#allocation7 + $0x78] sm:$0xff]  ;;  %s481_s11 = smov [#allocation8]  }
  0x27   :  { %341 = vmatprep.subr.mxu1 %v479_v0  ;;  %373 = vmatprep.mubr.msk.f32.mxu1 %vm480_vm0, %v479_v0  ;;  %v72_v6 = vld [vmem:[#allocation5 + $0x58] sm:$0xff]  ;;  %v169_v7 = vld [vmem:[#allocation7 + $0x70] sm:$0xff]  ;;  %v168_v8 = vld [vmem:[#allocation7 + $0x68] sm:$0xff] }
  0x28   :  { %307 = vmatpush3.msra.mxu0 %v76_v1  ;;  %342 = vmatpush3.msra.mxu1 %v170_v5  ;;  %v71_v9 = vld [vmem:[#allocation5 + $0x50] sm:$0xff]  ;;  %v167_v10 = vld [vmem:[#allocation7 + $0x60] sm:$0xff]  ;;  %v70_v11 = vld [vmem:[#allocation5 + $0x48] sm:$0xff] }
  0x29   :  { %308 = vmatprep.subr.mxu0 %v479_v0  ;;  %343 = vmatprep.subr.mxu1 %v479_v0  ;;  %v166_v12 = vld [vmem:[#allocation7 + $0x58] sm:$0xff]  ;;  %v69_v13 = vld [vmem:[#allocation5 + $0x40] sm:$0xff]  ;;  %v165_v14 = vld [vmem:[#allocation7 + $0x50] sm:$0xff] }
  0x2a   :  { %309 = vmatpush3.msra.mxu0 %v75_v2  ;;  %344 = vmatpush3.msra.mxu1 %v169_v7  ;;  %v68_v15 = vld [vmem:[#allocation5 + $0x38] sm:$0xff]  ;;  %v164_v16 = vld [vmem:[#allocation7 + $0x48] sm:$0xff]  ;;  %v67_v17 = vld [vmem:[#allocation5 + $0x30] sm:$0xff] }
  0x2b   :  { %310 = vmatprep.subr.mxu0 %v479_v0  ;;  %345 = vmatprep.subr.mxu1 %v479_v0  ;;  %v163_v18 = vld [vmem:[#allocation7 + $0x40] sm:$0xff]  ;;  %v66_v19 = vld [vmem:[#allocation5 + $0x28] sm:$0xff]  ;;  %v162_v20 = vld [vmem:[#allocation7 + $0x38] sm:$0xff] }
  0x2c   :  { %311 = vmatpush3.msra.mxu0 %v74_v3  ;;  %346 = vmatpush3.msra.mxu1 %v168_v8  ;;  %v65_v21 = vld [vmem:[#allocation5 + $0x20] sm:$0xff]  ;;  %v161_v22 = vld [vmem:[#allocation7 + $0x30] sm:$0xff]  ;;  %v64_v23 = vld [vmem:[#allocation5 + $0x18] sm:$0xff] }
  0x2d   :  { %312 = vmatprep.subr.mxu0 %v479_v0  ;;  %347 = vmatprep.subr.mxu1 %v479_v0  ;;  %v160_v24 = vld [vmem:[#allocation7 + $0x28] sm:$0xff]  ;;  %v63_v25 = vld [vmem:[#allocation5 + $0x10] sm:$0xff]  ;;  %v159_v26 = vld [vmem:[#allocation7 + $0x20] sm:$0xff] }
  0x2e   :  { %313 = vmatpush3.msra.mxu0 %v73_v4  ;;  %348 = vmatpush3.msra.mxu1 %v167_v10  ;;  %v62_v27 = vld [vmem:[#allocation5 + $0x8] sm:$0xff]  ;;  %v158_v28 = vld [vmem:[#allocation7 + $0x18] sm:$0xff]  ;;  %v61_v29 = vld [vmem:[#allocation5] sm:$0xff] }
  0x2f   :  { %314 = vmatprep.subr.mxu0 %v479_v0  ;;  %349 = vmatprep.subr.mxu1 %v479_v0  ;;  %v60_v30 = vld [vmem:[#allocation2] sm:$0xff]  ;;  %v157_v31 = vld [vmem:[#allocation7 + $0x10] sm:$0xff]  ;;  %v156_v32 = vld [vmem:[#allocation7 + $0x8] sm:$0xff] }
  0x30   :  { %315 = vmatpush3.msra.mxu0 %v72_v6  ;;  %350 = vmatpush3.msra.mxu1 %v166_v12  ;;  %v155_v33 = vld [vmem:[#allocation7] sm:$0xff]  ;;  %v270_v34 = vld [vmem:[%s566_s2] ss:$0 sm:$0xff]  ;;  %s260_s2 = sshll.u32 %s481_s11, 4  ;;  %s261_s2 = int_to_ptr.vmem [resolvable:$true] %s260_s2 }
  0x31   :  { %316 = vmatprep.subr.mxu0 %v479_v0  ;;  %351 = vmatprep.subr.mxu1 %v479_v0  ;;  %v271_v39 = vld [vmem:[%s568_s4] ss:$0 sm:$0xff]  ;;  %s448_s12 = scalar_lea.vmem %s261_s2, 128  ;;  %p453_p2 = scmp.lt.s32.totalorder %s261_s2, %s261_s2 }
  0x32   :  { %317 = vmatpush3.msra.mxu0 %v71_v9  ;;  %352 = vmatpush3.msra.mxu1 %v165_v14  ;;  %p449_p1 = scmp.ne.s32.totalorder %s261_s2, %s448_s12  ;;  %p454_p3 = scmp.lt.s32.totalorder %s448_s12, %s448_s12 }
  0x33   :  { %318 = vmatprep.subr.mxu0 %v479_v0  ;;  %353 = vmatprep.subr.mxu1 %v479_v0 }
  0x34   :  { %319 = vmatpush3.msra.mxu0 %v70_v11  ;;  %354 = vmatpush3.msra.mxu1 %v164_v16  ;;  %p455_p4 = por %p454_p3, %p453_p2 }
  0x35   :  { %320 = vmatprep.subr.mxu0 %v479_v0  ;;  %355 = vmatprep.subr.mxu1 %v479_v0 }
  0x36   :  { %321 = vmatpush3.msra.mxu0 %v69_v13  ;;  %356 = vmatpush3.msra.mxu1 %v163_v18  ;;  %p456_p5 = pnand %p455_p4, %p449_p1 }
  0x37   :  { %322 = vmatprep.subr.mxu0 %v479_v0  ;;  %357 = vmatprep.subr.mxu1 %v479_v0 }
  0x38   :  { %323 = vmatpush3.msra.mxu0 %v68_v15  ;;  %358 = vmatpush3.msra.mxu1 %v162_v20 }
  0x39   :  { %324 = vmatprep.subr.mxu0 %v479_v0  ;;  %359 = vmatprep.subr.mxu1 %v479_v0 }
  0x3a   :  { %325 = vmatpush3.msra.mxu0 %v67_v17  ;;  %360 = vmatpush3.msra.mxu1 %v161_v22 }
  0x3b   :  { %326 = vmatprep.subr.mxu0 %v479_v0  ;;  %361 = vmatprep.subr.mxu1 %v479_v0 }
  0x3c   :  { %327 = vmatpush3.msra.mxu0 %v66_v19  ;;  %362 = vmatpush3.msra.mxu1 %v160_v24 }
  0x3d   :  { %328 = vmatprep.subr.mxu0 %v479_v0  ;;  %363 = vmatprep.subr.mxu1 %v479_v0 }
  0x3e   :  { %329 = vmatpush3.msra.mxu0 %v65_v21  ;;  %364 = vmatpush3.msra.mxu1 %v159_v26 }
  0x3f   :  { %330 = vmatprep.subr.mxu0 %v479_v0  ;;  %365 = vmatprep.subr.mxu1 %v479_v0 }
  0x40   :  { %331 = vmatpush3.msra.mxu0 %v64_v23  ;;  %366 = vmatpush3.msra.mxu1 %v158_v28 }
  0x41   :  { %332 = vmatprep.subr.mxu0 %v479_v0  ;;  %367 = vmatprep.subr.mxu1 %v479_v0 }
  0x42   :  { %333 = vmatpush3.msra.mxu0 %v63_v25  ;;  %368 = vmatpush3.msra.mxu1 %v157_v31 }
  0x43   :  { %334 = vmatprep.subr.mxu0 %v479_v0  ;;  %369 = vmatprep.subr.mxu1 %v479_v0 }
  0x44   :  { %335 = vmatpush3.msra.mxu0 %v62_v27  ;;  %370 = vmatpush3.msra.mxu1 %v156_v32 }
  0x45   :  { %336 = vmatprep.subr.mxu0 %v479_v0  ;;  %371 = vmatprep.subr.mxu1 %v479_v0 }
  0x46   :  { %337 = vmatpush3.msra.mxu0 %v61_v29  ;;  %372 = vmatpush3.msra.mxu1 %v155_v33 }
  0x47   :  { %339 = vmatmul.mubr.f32.vlgmr.msra.gmra.mxu0 %v60_v30 }
 0x107   :  { %v150_v35 = vpop.f32.mrf.mxu0 }
 0x108   :  { %v151_v36 = vadd.f32 %v270_v34, %v150_v35 }
 0x109   :  { %v340_v37 = vpop.f32.mrf.mxu0 }
 0x10a   :  { %v154_v38 = vmax.f32 %v151_v36, 0.0 }
 0x10c   :  { %374 = vmatmul.mubr.f32.vlgmr.msra.gmra.mxu1 %v154_v38 }
 0x1cc   :  { %v244_v40 = vpop.f32.mrf.mxu1 }
 0x1cd   :  { %v245_v41 = vadd.f32 %v271_v39, %v244_v40 }
 0x1ce   :  { %v375_v42 = vpop.f32.mrf.mxu1 }
 0x1cf   :  { %v248_v43 = vsub.f32 0.0, %v245_v41 }
 0x1d1   :  { %v249_v44 = vmul.f32 1.442695, %v248_v43 }
 0x1d3   :  { %384 = vpow2.f32 %v249_v44 }
 0x1e0   :  { %v385_v45 = vpop.eup %384 }
 0x1e1   :  { %v251_v46 = vadd.f32 1.0, %v385_v45 }
 0x1e3   :  { %386 = vrcp.f32 %v251_v46 }
 0x1f0   :  { %v387_v47 = vpop.eup %386 }
 0x1f1   :  { %253 = vst [vmem:[#allocation8] sm:$0xff] %v387_v47 }
 0x1f2   :  { %459 = shalt.err (!%p456_p5)
}
 0x1f3   :  { %263 = dma.vmem_to_hbm [thread:$0]  %s261_s2, 128, %s569_s5, [#allocation4]  }
 0x1f4   :  { %472 = dma.done.wait [#allocation4], 128  }
 0x1f5   :  { %473 = vsyncadd [#allocation4], 4294967168 }
 0x1f6   :  { %267 = vsyncpa [#allocation3], 1 }
 0x1f7   :  { %268 = vsyncpa [#allocation6], 1 }
 0x1f8   :  { %269 = vsyncpa [#allocation4], 1 }

</bundles_post_ra>
